<compile_context>
chip_gen: v7x
topology: tpu7x:2x2x1
jax: 0.10.0
libtpu: 0.0.40
codegen_flags: <defaults>
</compile_context>

<pallas_src>
import jax
import jax.numpy as jnp
from jax.experimental import pallas as pl
from jax.experimental.pallas import tpu as pltpu


def _critic_kernel(x_ref, w1_ref, b1_ref, w2_ref, b2_ref, o_ref):
    # fc1 on the MXU, f32 accumulation: [TM, D] @ [D, H] -> [TM, H]
    h = jnp.dot(x_ref[...], w1_ref[...], preferred_element_type=jnp.float32)
    h = jnp.maximum(h + b1_ref[...], 0.0)          # bias + ReLU on the VPU
    # fc2 as an N=1 MXU matmul: [TM, H] @ [H, 1] -> [TM, 1].  Padded hidden
    # lanes contribute nothing (relu(0)=0 and w2_pad=0).
    v = jnp.dot(h, w2_ref[...], preferred_element_type=jnp.float32)
    o_ref[...] = (v + b2_ref[0, 0]).astype(o_ref.dtype)


def _round_up(n, m):
    return ((n + m - 1) // m) * m


def _physical_vmem_bytes():
    """Per-TensorCore VMEM capacity; conservative (v7x) fallback."""
    try:
        info = pltpu.get_tpu_info()
        for attr in ("vmem_capacity_bytes", "vmem_size_bytes", "vmem_bytes"):
            v = getattr(info, attr, None)
            if v:
                return int(v)
    except Exception:
        pass
    return 64 * 1024 * 1024


def _resident_spec(block_shape, use_buffered):
    """BlockSpec for an operand whose block never changes across the grid."""
    if use_buffered:
        # Single buffer: the default double-buffer is pure VMEM waste for a
        # constant index_map (matters most on v7x's 64 MiB VMEM).
        return pl.BlockSpec(block_shape, lambda i: (0, 0),
                            pipeline_mode=pl.Buffered(1))
    return pl.BlockSpec(block_shape, lambda i: (0, 0))


def critic_forward(x, w1, b1, w2, b2, *, block_m=None, use_bf16=False):
    """Critic forward pass.

    x: [B, D]; w1: [D, hidden] (transposed vs. PyTorch); b1: [1, hidden];
    w2: [hidden, 1]; b2: [1, 1].  Returns [B, 1] float32.
    """
    B, D = x.shape
    hidden = w1.shape[1]
    H = max(128, _round_up(hidden, 128))        # lane-pad hidden -> full vregs

    in_dtype = jnp.bfloat16 if use_bf16 else jnp.float32
    xk = x.astype(in_dtype)
    # Zero-pad the hidden axis: relu(0)=0 and w2_pad=0, so padded units are
    # exactly inert.
    w1p = jnp.pad(w1.astype(in_dtype), ((0, 0), (0, H - hidden)))
    b1p = jnp.pad(b1.reshape(1, hidden).astype(jnp.float32),
                  ((0, 0), (0, H - hidden)))
    w2p = jnp.pad(w2.reshape(hidden, 1).astype(jnp.float32),
                  ((0, H - hidden), (0, 0)))
    b2p = b2.reshape(1, 1).astype(jnp.float32)

    # ---- VMEM budget & batch-tile sizing -----------------------------------
    itemsize = 2 if use_bf16 else 4
    row_align = 16 if use_bf16 else 8           # sublane packing of the x tile
    d_lanes = _round_up(D, 128)                 # VMEM lane padding of x rows
    # Per batch-row VMEM: x tile (2 buffers, lane padded) + (tm,1) out tile
    # (2 buffers, padded to (8,128) f32 tiles -> 512 B / row / buffer).
    bytes_per_row = 2 * d_lanes * itemsize + 2 * 512
    # Resident operands (counted at 2 buffers to stay safe on the fallback
    # path without Buffered(1)).
    resident = (2 * _round_up(D, 8) * H * itemsize        # w1
                + 2 * 8 * H * 4                           # b1 (sublane pad)
                + 2 * _round_up(H, 8) * 128 * 4)          # w2 column (lane pad)

    vmem_limit = (_physical_vmem_bytes() * 3) // 4   # 48 MiB v7x, 96 MiB v5e/v6e
    stream_budget = max((vmem_limit * 4) // 5 - resident, 2 * 1024 * 1024)

    tm = stream_budget // bytes_per_row
    tm = min(tm, _round_up(B, row_align))
    if block_m is not None:
        tm = min(tm, _round_up(block_m, row_align))
    tm = max(row_align, (tm // row_align) * row_align)

    # Ragged last tile: OOB input reads are clipped, OOB output writes masked,
    # so no wrapper-side padding (and no extra HBM copy of x) is needed.
    grid = (pl.cdiv(B, tm),)

    cost = pl.CostEstimate(
        flops=2 * B * D * H + 4 * B * H,
        transcendentals=0,
        bytes_accessed=(B * D * itemsize + D * H * itemsize
                        + 2 * H * 4 + 4 + B * 4),
    )

    def _call(use_buffered):
        return pl.pallas_call(
            _critic_kernel,
            out_shape=jax.ShapeDtypeStruct((B, 1), jnp.float32),
            grid_spec=pltpu.PrefetchScalarGridSpec(
                num_scalar_prefetch=0,
                grid=grid,
                in_specs=[
                    pl.BlockSpec((tm, D), lambda i: (i, 0)),   # x: streamed
                    _resident_spec((D, H), use_buffered),      # w1: resident
                    _resident_spec((1, H), use_buffered),      # b1: resident
                    _resident_spec((H, 1), use_buffered),      # w2: resident
                    pl.BlockSpec(memory_space=pltpu.MemorySpace.SMEM),  # b2
                ],
                out_specs=pl.BlockSpec((tm, 1), lambda i: (i, 0)),
            ),
            compiler_params=pltpu.CompilerParams(
                dimension_semantics=("parallel",),
                vmem_limit_bytes=vmem_limit,
            ),
            cost_estimate=cost,
        )(xk, w1p, b1p, w2p, b2p)

    try:
        return _call(True)
    except Exception:
        # Fallback if this jax build rejects pipeline_mode=pl.Buffered(1).
        return _call(False)


def init_critic_params(key, input_size, hidden=64):
    """Deterministic init matching nn.Linear's uniform(-1/sqrt(fan_in), ...)."""
    k1, k2, k3, k4 = jax.random.split(key, 4)
    bound1 = 1.0 / jnp.sqrt(jnp.float32(input_size))
    bound2 = 1.0 / jnp.sqrt(jnp.float32(hidden))
    # Stored transposed vs. PyTorch ([in, out] instead of [out, in]).
    w1 = jax.random.uniform(k1, (input_size, hidden), jnp.float32, -bound1, bound1)
    b1 = jax.random.uniform(k2, (1, hidden), jnp.float32, -bound1, bound1)
    w2 = jax.random.uniform(k3, (hidden, 1), jnp.float32, -bound2, bound2)
    b2 = jax.random.uniform(k4, (1, 1), jnp.float32, -bound2, bound2)
    return w1, b1, w2, b2


def _reference(x, w1, b1, w2, b2):
    return jnp.maximum(x @ w1 + b1, 0.0) @ w2 + b2


if __name__ == "__main__":
    key = jax.random.PRNGKey(0)
    kx, kp, kx2 = jax.random.split(key, 3)

    batch = 8
    input_size = 32  # the module's `input_size` constructor arg

    x = jax.random.normal(kx, (batch, input_size), jnp.float32)
    w1, b1, w2, b2 = init_critic_params(kp, input_size)

    out = jax.block_until_ready(critic_forward(x, w1, b1, w2, b2))
    ref = _reference(x, w1, b1, w2, b2)
    assert out.shape == (batch, 1)
    assert jnp.allclose(out, ref, atol=5e-5, rtol=5e-5)

    # Ragged batch: exercises the cdiv grid + masked last tile (no wrapper
    # padding, no extra HBM copy of x).
    x2 = jax.random.normal(kx2, (37, input_size), jnp.float32)
    out2 = jax.block_until_ready(critic_forward(x2, w1, b1, w2, b2, block_m=16))
    ref2 = _reference(x2, w1, b1, w2, b2)
    assert out2.shape == (37, 1)
    assert jnp.allclose(out2, ref2, atol=5e-5, rtol=5e-5)

    print("KERNEL_OK")
</pallas_src>

<mosaic_0001>
module attributes {stable_mosaic.version = 11 : i64} {
  func.func @_critic_kernel(%arg0: i32, %arg1: memref<8x32xf32, #tpu.memory_space<vmem>>, %arg2: memref<32x128xf32, #tpu.memory_space<vmem>>, %arg3: memref<1x128xf32, #tpu.memory_space<vmem>>, %arg4: memref<128x1xf32, #tpu.memory_space<vmem>>, %arg5: memref<1x1xf32, #tpu.memory_space<smem>>, %arg6: memref<8x1xf32, #tpu.memory_space<vmem>>) attributes {dimension_semantics = [#tpu.dimension_semantics<parallel>], iteration_bounds = array<i64: 1>, scalar_prefetch = 0 : i64, scratch_operands = 0 : i64, tpu.core_type = #tpu.core_type<tc>, window_params = [{transform_indices = @transform_0, window_bounds = array<i64: 8, 32>}, {pipeline_mode = #tpu.pipeline_mode<synchronous>, transform_indices = @transform_1, window_bounds = array<i64: 32, 128>}, {pipeline_mode = #tpu.pipeline_mode<synchronous>, transform_indices = @transform_2, window_bounds = array<i64: 1, 128>}, {pipeline_mode = #tpu.pipeline_mode<synchronous>, transform_indices = @transform_3, window_bounds = array<i64: 128, 1>}, {transform_indices = @transform_4, window_bounds = array<i64: 1, 1>}, {transform_indices = @transform_5, window_bounds = array<i64: 8, 1>}]} {
    %c0 = arith.constant 0 : index
    %c0_0 = arith.constant 0 : index
    %0 = vector.load %arg1[%c0, %c0_0] : memref<8x32xf32, #tpu.memory_space<vmem>>, vector<8x32xf32>
    %c0_1 = arith.constant 0 : index
    %c0_2 = arith.constant 0 : index
    %1 = vector.load %arg2[%c0_1, %c0_2] : memref<32x128xf32, #tpu.memory_space<vmem>>, vector<32x128xf32>
    %cst = arith.constant dense<0.000000e+00> : vector<8x128xf32>
    %2 = tpu.matmul %0, %1, %cst {dimension_numbers = #tpu.dot_dimension_numbers<[1], [0], [0], [1], [0, 0, 1, 1], [], []>} : vector<8x32xf32>, vector<32x128xf32>, vector<8x128xf32> -> vector<8x128xf32>
    %c0_3 = arith.constant 0 : index
    %c0_4 = arith.constant 0 : index
    %3 = vector.load %arg3[%c0_3, %c0_4] : memref<1x128xf32, #tpu.memory_space<vmem>>, vector<1x128xf32>
    %4 = vector.broadcast %3 : vector<1x128xf32> to vector<8x128xf32>
    %5 = arith.addf %2, %4 : vector<8x128xf32>
    %cst_5 = arith.constant 0.000000e+00 : f32
    %6 = vector.broadcast %cst_5 : f32 to vector<8x128xf32>
    %7 = arith.maximumf %5, %6 : vector<8x128xf32>
    %c0_6 = arith.constant 0 : index
    %c0_7 = arith.constant 0 : index
    %8 = vector.load %arg4[%c0_6, %c0_7] : memref<128x1xf32, #tpu.memory_space<vmem>>, vector<128x1xf32>
    %cst_8 = arith.constant dense<0.000000e+00> : vector<8x1xf32>
    %9 = tpu.matmul %7, %8, %cst_8 {dimension_numbers = #tpu.dot_dimension_numbers<[1], [0], [0], [1], [0, 0, 1, 1], [], []>} : vector<8x128xf32>, vector<128x1xf32>, vector<8x1xf32> -> vector<8x1xf32>
    %c0_9 = arith.constant 0 : index
    %c0_10 = arith.constant 0 : index
    %10 = memref.load %arg5[%c0_9, %c0_10] : memref<1x1xf32, #tpu.memory_space<smem>>
    %11 = vector.broadcast %10 : f32 to vector<8x1xf32>
    %12 = arith.addf %9, %11 : vector<8x1xf32>
    %c0_11 = arith.constant 0 : index
    %c0_12 = arith.constant 0 : index
    %13 = vector.load %arg6[%c0_11, %c0_12] : memref<8x1xf32, #tpu.memory_space<vmem>>, vector<8x1xf32>
    tpu.vector_store %arg6[%c0_11, %c0_12], %12 {strides = array<i32>} : memref<8x1xf32, #tpu.memory_space<vmem>>, vector<8x1xf32>,
    return
  }
  func.func @transform_0(%arg0: i32) -> (i32, i32) {
    %c0_i32 = arith.constant 0 : i32
    %c0_i32_0 = arith.constant 0 : i32
    return %arg0, %c0_i32 : i32, i32
  }
  func.func @transform_1(%arg0: i32) -> (i32, i32) {
    %c0_i32 = arith.constant 0 : i32
    %c0_i32_0 = arith.constant 0 : i32
    %c0_i32_1 = arith.constant 0 : i32
    return %c0_i32, %c0_i32_0 : i32, i32
  }
  func.func @transform_2(%arg0: i32) -> (i32, i32) {
    %c0_i32 = arith.constant 0 : i32
    %c0_i32_0 = arith.constant 0 : i32
    %c0_i32_1 = arith.constant 0 : i32
    return %c0_i32, %c0_i32_0 : i32, i32
  }
  func.func @transform_3(%arg0: i32) -> (i32, i32) {
    %c0_i32 = arith.constant 0 : i32
    %c0_i32_0 = arith.constant 0 : i32
    %c0_i32_1 = arith.constant 0 : i32
    return %c0_i32, %c0_i32_0 : i32, i32
  }
  func.func @transform_4(%arg0: i32) -> (i32, i32) {
    %c0_i32 = arith.constant 0 : i32
    %c0_i32_0 = arith.constant 0 : i32
    %c0_i32_1 = arith.constant 0 : i32
    return %c0_i32, %c0_i32_0 : i32, i32
  }
  func.func @transform_5(%arg0: i32) -> (i32, i32) {
    %c0_i32 = arith.constant 0 : i32
    %c0_i32_0 = arith.constant 0 : i32
    return %arg0, %c0_i32 : i32, i32
  }
}

module attributes {stable_mosaic.version = 11 : i64} {
  func.func @_critic_kernel(%arg0: i32, %arg1: memref<8x32xf32, #tpu.memory_space<vmem>>, %arg2: memref<32x128xf32, #tpu.memory_space<vmem>>, %arg3: memref<1x128xf32, #tpu.memory_space<vmem>>, %arg4: memref<128x1xf32, #tpu.memory_space<vmem>>, %arg5: memref<1x1xf32, #tpu.memory_space<smem>>, %arg6: memref<8x1xf32, #tpu.memory_space<vmem>>) attributes {dimension_semantics = [#tpu.dimension_semantics<parallel>], iteration_bounds = array<i64: 1>, scalar_prefetch = 0 : i64, scratch_operands = 0 : i64, tpu.core_type = #tpu.core_type<tc>, window_params = [{transform_indices = @transform_0, window_bounds = array<i64: 8, 32>}, {pipeline_mode = #tpu.pipeline_mode<synchronous>, transform_indices = @transform_1, window_bounds = array<i64: 32, 128>}, {pipeline_mode = #tpu.pipeline_mode<synchronous>, transform_indices = @transform_2, window_bounds = array<i64: 1, 128>}, {pipeline_mode = #tpu.pipeline_mode<synchronous>, transform_indices = @transform_3, window_bounds = array<i64: 128, 1>}, {transform_indices = @transform_4, window_bounds = array<i64: 1, 1>}, {transform_indices = @transform_5, window_bounds = array<i64: 8, 1>}]} {
    %c0 = arith.constant 0 : index
    %c0_0 = arith.constant 0 : index
    %0 = vector.load %arg1[%c0, %c0_0] : memref<8x32xf32, #tpu.memory_space<vmem>>, vector<8x32xf32>
    %c0_1 = arith.constant 0 : index
    %c0_2 = arith.constant 0 : index
    %1 = vector.load %arg2[%c0_1, %c0_2] : memref<32x128xf32, #tpu.memory_space<vmem>>, vector<32x128xf32>
    %cst = arith.constant dense<0.000000e+00> : vector<8x128xf32>
    %2 = tpu.matmul %0, %1, %cst {dimension_numbers = #tpu.dot_dimension_numbers<[1], [0], [0], [1], [0, 0, 1, 1], [], []>} : vector<8x32xf32>, vector<32x128xf32>, vector<8x128xf32> -> vector<8x128xf32>
    %c0_3 = arith.constant 0 : index
    %c0_4 = arith.constant 0 : index
    %3 = vector.load %arg3[%c0_3, %c0_4] : memref<1x128xf32, #tpu.memory_space<vmem>>, vector<1x128xf32>
    %4 = vector.broadcast %3 : vector<1x128xf32> to vector<8x128xf32>
    %5 = arith.addf %2, %4 : vector<8x128xf32>
    %cst_5 = arith.constant 0.000000e+00 : f32
    %6 = vector.broadcast %cst_5 : f32 to vector<8x128xf32>
    %7 = arith.maximumf %5, %6 : vector<8x128xf32>
    %c0_6 = arith.constant 0 : index
    %c0_7 = arith.constant 0 : index
    %8 = vector.load %arg4[%c0_6, %c0_7] : memref<128x1xf32, #tpu.memory_space<vmem>>, vector<128x1xf32>
    %cst_8 = arith.constant dense<0.000000e+00> : vector<8x1xf32>
    %9 = tpu.matmul %7, %8, %cst_8 {dimension_numbers = #tpu.dot_dimension_numbers<[1], [0], [0], [1], [0, 0, 1, 1], [], []>} : vector<8x128xf32>, vector<128x1xf32>, vector<8x1xf32> -> vector<8x1xf32>
    %c0_9 = arith.constant 0 : index
    %c0_10 = arith.constant 0 : index
    %10 = memref.load %arg5[%c0_9, %c0_10] : memref<1x1xf32, #tpu.memory_space<smem>>
    %11 = vector.broadcast %10 : f32 to vector<8x1xf32>
    %12 = arith.addf %9, %11 : vector<8x1xf32>
    %c0_11 = arith.constant 0 : index
    %c0_12 = arith.constant 0 : index
    %13 = vector.load %arg6[%c0_11, %c0_12] : memref<8x1xf32, #tpu.memory_space<vmem>>, vector<8x1xf32>
    tpu.vector_store %arg6[%c0_11, %c0_12], %12 {strides = array<i32>} : memref<8x1xf32, #tpu.memory_space<vmem>>, vector<8x1xf32>,
    return
  }
  func.func @transform_0(%arg0: i32) -> (i32, i32) {
    %c0_i32 = arith.constant 0 : i32
    %c0_i32_0 = arith.constant 0 : i32
    return %arg0, %c0_i32 : i32, i32
  }
  func.func @transform_1(%arg0: i32) -> (i32, i32) {
    %c0_i32 = arith.constant 0 : i32
    %c0_i32_0 = arith.constant 0 : i32
    %c0_i32_1 = arith.constant 0 : i32
    return %c0_i32, %c0_i32_0 : i32, i32
  }
  func.func @transform_2(%arg0: i32) -> (i32, i32) {
    %c0_i32 = arith.constant 0 : i32
    %c0_i32_0 = arith.constant 0 : i32
    %c0_i32_1 = arith.constant 0 : i32
    return %c0_i32, %c0_i32_0 : i32, i32
  }
  func.func @transform_3(%arg0: i32) -> (i32, i32) {
    %c0_i32 = arith.constant 0 : i32
    %c0_i32_0 = arith.constant 0 : i32
    %c0_i32_1 = arith.constant 0 : i32
    return %c0_i32, %c0_i32_0 : i32, i32
  }
  func.func @transform_4(%arg0: i32) -> (i32, i32) {
    %c0_i32 = arith.constant 0 : i32
    %c0_i32_0 = arith.constant 0 : i32
    %c0_i32_1 = arith.constant 0 : i32
    return %c0_i32, %c0_i32_0 : i32, i32
  }
  func.func @transform_5(%arg0: i32) -> (i32, i32) {
    %c0_i32 = arith.constant 0 : i32
    %c0_i32_0 = arith.constant 0 : i32
    return %arg0, %c0_i32 : i32, i32
  }
}

</mosaic_0001>

<bundles_post_ra>
// kernel: tpu_custom_call.1
= control target key start
LH: loop header
LB: loop body
LE: loop exit
PB: predicated region body
PF: predicated region fallthrough
CT: control target
= control target key end

     0   :  { %v305_v0 = vmov 0.0|0.0   ;;  %vm306_vm0 = vmmov 0   ;;  %v307_v4 = vmov 0.0   ;;  %vm33_vm1 = vcmask 261120   ;;  %s410_s1 = inlined_call_operand.vmem [shape: f32[32,128], index: 1, kind: input, shape index: {}]   ;;  %s411_s3 = inlined_call_operand.vmem [shape: f32[128,1], index: 3, kind: input, shape index: {}]   ;;  %s412_s0 = inlined_call_operand.vmem [shape: f32[8,32], index: 0, kind: input, shape index: {}]   ;;  %s413_s2 = inlined_call_operand.vmem [shape: f32[1,128], index: 2, kind: input, shape index: {}]   ;;  %s414_s4 = inlined_call_operand.<no memory space> [shape: f32[1,1], index: 4, kind: input, shape index: {}]   ;;  %s415_s5 = inlined_call_operand.vmem [shape: f32[8,1], index: 5, kind: output, shape index: {}]  }
   0x1   :  { %272 = vmatprep.subr.bf16.mxu0 %v305_v0  ;;  %v22_v1 = vld [vmem:[%s410_s1] sm:$0xff]  ;;  %v23_v2 = vld [vmem:[%s410_s1 + $0x8] sm:$0xff]  ;;  %v24_v3 = vld [vmem:[%s410_s1 + $0x10] sm:$0xff]  ;;  %234 = vmatprep.mubr.msk.f32.mxu0 %vm306_vm0, %v307_v4  ;;  %v125_v38 = vstv %s414_s4  ;;  %vm196_vm2 = vcmask 7168  }
   0x2   :  { %v273_v5 = vpack.c.bf16 %v23_v2, %v22_v1  ;;  %v25_v6 = vld [vmem:[%s410_s1 + $0x18] sm:$0xff]  ;;  %278 = vmatprep.subr.bf16.mxu1 %v305_v0  ;;  %v108_v7 = vld [vmem:[%s411_s3] sm:$0xff]  ;;  %269 = vmatprep.mubr.msk.f32.mxu1 %vm306_vm0, %v307_v4  ;;  %v109_v8 = vld [vmem:[%s411_s3 + $0x8] sm:$0xff] }
   0x3   :  { %v110_v9 = vld [vmem:[%s411_s3 + $0x10] sm:$0xff]  ;;  %v111_v10 = vld [vmem:[%s411_s3 + $0x18] sm:$0xff]  ;;  %v276_v11 = vpack.c.bf16 %v25_v6, %v24_v3  ;;  %v279_v12 = vpack.c.bf16 %v109_v8, %v108_v7  ;;  %v112_v14 = vld [vmem:[%s411_s3 + $0x20] sm:$0xff] }
   0x4   :  { %274 = vmatpush3.bf16.msra.mxu0 %v273_v5  ;;  %v282_v13 = vpack.c.bf16 %v111_v10, %v110_v9  ;;  %v113_v15 = vld [vmem:[%s411_s3 + $0x28] sm:$0xff]  ;;  %v21_v16 = vld [vmem:[%s412_s0] sm:$0xff]  ;;  %v114_v18 = vld [vmem:[%s411_s3 + $0x30] sm:$0xff] }
   0x5   :  { %275 = vmatprep.subr.bf16.mxu0 %v305_v0  ;;  %280 = vmatpush3.bf16.msra.mxu1 %v279_v12  ;;  %v285_v17 = vpack.c.bf16 %v113_v15, %v112_v14  ;;  %v115_v19 = vld [vmem:[%s411_s3 + $0x38] sm:$0xff]  ;;  %v116_v21 = vld [vmem:[%s411_s3 + $0x40] sm:$0xff]  ;;  %v117_v22 = vld [vmem:[%s411_s3 + $0x48] sm:$0xff] }
   0x6   :  { %281 = vmatprep.subr.bf16.mxu1 %v305_v0  ;;  %v288_v20 = vpack.c.bf16 %v115_v19, %v114_v18  ;;  %v291_v23 = vpack.c.bf16 %v117_v22, %v116_v21  ;;  %v118_v24 = vld [vmem:[%s411_s3 + $0x50] sm:$0xff]  ;;  %v119_v25 = vld [vmem:[%s411_s3 + $0x58] sm:$0xff]  ;;  %v120_v27 = vld [vmem:[%s411_s3 + $0x60] sm:$0xff] }
   0x7   :  { %v294_v26 = vpack.c.bf16 %v119_v25, %v118_v24  ;;  %v121_v28 = vld [vmem:[%s411_s3 + $0x68] sm:$0xff]  ;;  %v122_v30 = vld [vmem:[%s411_s3 + $0x70] sm:$0xff]  ;;  %v123_v31 = vld [vmem:[%s411_s3 + $0x78] sm:$0xff] }
   0x8   :  { %277 = vmatpush3.bf16.msra.mxu0 %v276_v11  ;;  %v297_v29 = vpack.c.bf16 %v121_v28, %v120_v27  ;;  %v300_v32 = vpack.c.bf16 %v123_v31, %v122_v30  ;;  %v202_v33 = vld [vmem:[%s413_s2] ss:$0 sm:$0xff] }
   0x9   :  { %283 = vmatpush3.bf16.msra.mxu1 %v282_v13 }
   0xa   :  { %284 = vmatprep.subr.bf16.mxu1 %v305_v0 }
   0xb   :  { %235 = vmatmul.mubr.msk.f32.vlgmr.msra.gmra.mrb[0].mxu0 %vm33_vm1, %v21_v16 }
   0xd   :  { %286 = vmatpush3.bf16.msra.mxu1 %v285_v17 }
   0xe   :  { %287 = vmatprep.subr.bf16.mxu1 %v305_v0 }
  0x11   :  { %289 = vmatpush3.bf16.msra.mxu1 %v288_v20 }
  0x12   :  { %290 = vmatprep.subr.bf16.mxu1 %v305_v0 }
  0x15   :  { %292 = vmatpush3.bf16.msra.mxu1 %v291_v23 }
  0x16   :  { %293 = vmatprep.subr.bf16.mxu1 %v305_v0 }
  0x19   :  { %295 = vmatpush3.bf16.msra.mxu1 %v294_v26 }
  0x1a   :  { %296 = vmatprep.subr.bf16.mxu1 %v305_v0 }
  0x1d   :  { %298 = vmatpush3.bf16.msra.mxu1 %v297_v29 }
  0x1e   :  { %299 = vmatprep.subr.bf16.mxu1 %v305_v0 }
  0x21   :  { %301 = vmatpush3.bf16.msra.mxu1 %v300_v32 }
  0xde   :  { %v103_v34 = vpop.f32.mrb[0].mxu0 }
  0xdf   :  { %v104_v35 = vadd.f32 %v202_v33, %v103_v34  ;;  %v236_v36 = vpop.f32.mrb[1].mxu0 }
  0xe1   :  { %v107_v37 = vmax.f32 %v104_v35, 0.0 }
  0xe3   :  { %270 = vmatmul.mubr.f32.vlgmr.msra.gmra.mrb[0].mxu1 %v107_v37 }
 0x1b6   :  { %v192_v39 = vpop.f32.mrb[0].mxu1 }
 0x1b7   :  { %v193_v40 = vadd.f32 %v192_v39, %v125_v38  ;;  %v271_v41 = vpop.f32.mrb[1].mxu1 }
 0x1b9   :  { %197 = vst.msk [vmem:[%s415_s5] sm:$0xff] %vm196_vm2, %v193_v40 }

// kernel: tpu_custom_call.1
= control target key start
LH: loop header
LB: loop body
LE: loop exit
PB: predicated region body
PF: predicated region fallthrough
CT: control target
= control target key end

     0   :  { %v305_v0 = vmov 0.0|0.0   ;;  %vm306_vm0 = vmmov 0   ;;  %v307_v4 = vmov 0.0   ;;  %vm33_vm1 = vcmask 261120   ;;  %s410_s1 = inlined_call_operand.vmem [shape: f32[32,128], index: 1, kind: input, shape index: {}]   ;;  %s411_s3 = inlined_call_operand.vmem [shape: f32[128,1], index: 3, kind: input, shape index: {}]   ;;  %s412_s0 = inlined_call_operand.vmem [shape: f32[8,32], index: 0, kind: input, shape index: {}]   ;;  %s413_s2 = inlined_call_operand.vmem [shape: f32[1,128], index: 2, kind: input, shape index: {}]   ;;  %s414_s4 = inlined_call_operand.<no memory space> [shape: f32[1,1], index: 4, kind: input, shape index: {}]   ;;  %s415_s5 = inlined_call_operand.vmem [shape: f32[8,1], index: 5, kind: output, shape index: {}]  }
   0x1   :  { %272 = vmatprep.subr.bf16.mxu0 %v305_v0  ;;  %v22_v1 = vld [vmem:[%s410_s1] sm:$0xff]  ;;  %v23_v2 = vld [vmem:[%s410_s1 + $0x8] sm:$0xff]  ;;  %v24_v3 = vld [vmem:[%s410_s1 + $0x10] sm:$0xff]  ;;  %234 = vmatprep.mubr.msk.f32.mxu0 %vm306_vm0, %v307_v4  ;;  %v125_v38 = vstv %s414_s4  ;;  %vm196_vm2 = vcmask 7168  }
   0x2   :  { %v273_v5 = vpack.c.bf16 %v23_v2, %v22_v1  ;;  %v25_v6 = vld [vmem:[%s410_s1 + $0x18] sm:$0xff]  ;;  %278 = vmatprep.subr.bf16.mxu1 %v305_v0  ;;  %v108_v7 = vld [vmem:[%s411_s3] sm:$0xff]  ;;  %269 = vmatprep.mubr.msk.f32.mxu1 %vm306_vm0, %v307_v4  ;;  %v109_v8 = vld [vmem:[%s411_s3 + $0x8] sm:$0xff] }
   0x3   :  { %v110_v9 = vld [vmem:[%s411_s3 + $0x10] sm:$0xff]  ;;  %v111_v10 = vld [vmem:[%s411_s3 + $0x18] sm:$0xff]  ;;  %v276_v11 = vpack.c.bf16 %v25_v6, %v24_v3  ;;  %v279_v12 = vpack.c.bf16 %v109_v8, %v108_v7  ;;  %v112_v14 = vld [vmem:[%s411_s3 + $0x20] sm:$0xff] }
   0x4   :  { %274 = vmatpush3.bf16.msra.mxu0 %v273_v5  ;;  %v282_v13 = vpack.c.bf16 %v111_v10, %v110_v9  ;;  %v113_v15 = vld [vmem:[%s411_s3 + $0x28] sm:$0xff]  ;;  %v21_v16 = vld [vmem:[%s412_s0] sm:$0xff]  ;;  %v114_v18 = vld [vmem:[%s411_s3 + $0x30] sm:$0xff] }
   0x5   :  { %275 = vmatprep.subr.bf16.mxu0 %v305_v0  ;;  %280 = vmatpush3.bf16.msra.mxu1 %v279_v12  ;;  %v285_v17 = vpack.c.bf16 %v113_v15, %v112_v14  ;;  %v115_v19 = vld [vmem:[%s411_s3 + $0x38] sm:$0xff]  ;;  %v116_v21 = vld [vmem:[%s411_s3 + $0x40] sm:$0xff]  ;;  %v117_v22 = vld [vmem:[%s411_s3 + $0x48] sm:$0xff] }
   0x6   :  { %281 = vmatprep.subr.bf16.mxu1 %v305_v0  ;;  %v288_v20 = vpack.c.bf16 %v115_v19, %v114_v18  ;;  %v291_v23 = vpack.c.bf16 %v117_v22, %v116_v21  ;;  %v118_v24 = vld [vmem:[%s411_s3 + $0x50] sm:$0xff]  ;;  %v119_v25 = vld [vmem:[%s411_s3 + $0x58] sm:$0xff]  ;;  %v120_v27 = vld [vmem:[%s411_s3 + $0x60] sm:$0xff] }
   0x7   :  { %v294_v26 = vpack.c.bf16 %v119_v25, %v118_v24  ;;  %v121_v28 = vld [vmem:[%s411_s3 + $0x68] sm:$0xff]  ;;  %v122_v30 = vld [vmem:[%s411_s3 + $0x70] sm:$0xff]  ;;  %v123_v31 = vld [vmem:[%s411_s3 + $0x78] sm:$0xff] }
   0x8   :  { %277 = vmatpush3.bf16.msra.mxu0 %v276_v11  ;;  %v297_v29 = vpack.c.bf16 %v121_v28, %v120_v27  ;;  %v300_v32 = vpack.c.bf16 %v123_v31, %v122_v30  ;;  %v202_v33 = vld [vmem:[%s413_s2] ss:$0 sm:$0xff] }
   0x9   :  { %283 = vmatpush3.bf16.msra.mxu1 %v282_v13 }
   0xa   :  { %284 = vmatprep.subr.bf16.mxu1 %v305_v0 }
   0xb   :  { %235 = vmatmul.mubr.msk.f32.vlgmr.msra.gmra.mrb[0].mxu0 %vm33_vm1, %v21_v16 }
   0xd   :  { %286 = vmatpush3.bf16.msra.mxu1 %v285_v17 }
   0xe   :  { %287 = vmatprep.subr.bf16.mxu1 %v305_v0 }
  0x11   :  { %289 = vmatpush3.bf16.msra.mxu1 %v288_v20 }
  0x12   :  { %290 = vmatprep.subr.bf16.mxu1 %v305_v0 }
  0x15   :  { %292 = vmatpush3.bf16.msra.mxu1 %v291_v23 }
  0x16   :  { %293 = vmatprep.subr.bf16.mxu1 %v305_v0 }
  0x19   :  { %295 = vmatpush3.bf16.msra.mxu1 %v294_v26 }
  0x1a   :  { %296 = vmatprep.subr.bf16.mxu1 %v305_v0 }
  0x1d   :  { %298 = vmatpush3.bf16.msra.mxu1 %v297_v29 }
  0x1e   :  { %299 = vmatprep.subr.bf16.mxu1 %v305_v0 }
  0x21   :  { %301 = vmatpush3.bf16.msra.mxu1 %v300_v32 }
  0xde   :  { %v103_v34 = vpop.f32.mrb[0].mxu0 }
  0xdf   :  { %v104_v35 = vadd.f32 %v202_v33, %v103_v34  ;;  %v236_v36 = vpop.f32.mrb[1].mxu0 }
  0xe1   :  { %v107_v37 = vmax.f32 %v104_v35, 0.0 }
  0xe3   :  { %270 = vmatmul.mubr.f32.vlgmr.msra.gmra.mrb[0].mxu1 %v107_v37 }
 0x1b6   :  { %v192_v39 = vpop.f32.mrb[0].mxu1 }
 0x1b7   :  { %v193_v40 = vadd.f32 %v192_v39, %v125_v38  ;;  %v271_v41 = vpop.f32.mrb[1].mxu1 }
 0x1b9   :  { %197 = vst.msk [vmem:[%s415_s5] sm:$0xff] %vm196_vm2, %v193_v40 }

</bundles_post_ra>
